<compile_context>
chip_gen: v5e
topology: v5e:2x2
jax: 0.10.0
libtpu: 0.0.40
codegen_flags: <defaults>
</compile_context>

<pallas_src>
import jax
import jax.numpy as jnp
from jax.experimental import pallas as pl
from jax.experimental.pallas import tpu as pltpu


def _attention_pooling_kernel(x_ref, w_ref, o_ref, m_sc, d_sc, acc_sc):
    """One (batch-block, seq-tile) step of attention pooling.

    x_ref  : (Bt, St, D)  input tile, native dtype (bf16/f32), NOT up-cast
    w_ref  : (Bt, 1, D)   attention weight, pre-tiled + pre-cast, resident
    o_ref  : (Bt, 1, D)   pooled output block (resident across the seq axis)
    m_sc   : (Bt, 1, 1)   f32 running max of scores
    d_sc   : (Bt, 1, 1)   f32 running softmax denominator
    acc_sc : (Bt, 1, D)   f32 running un-normalized weighted sum
    """
    j = pl.program_id(1)

    @pl.when(j == 0)
    def _init():
        m_sc[...] = jnp.full(m_sc.shape, -jnp.inf, dtype=jnp.float32)
        d_sc[...] = jnp.zeros(d_sc.shape, dtype=jnp.float32)
        acc_sc[...] = jnp.zeros(acc_sc.shape, dtype=jnp.float32)

    x = x_ref[...]                      # (Bt,St,D) native dtype
    w = w_ref[...]                      # (Bt,1,D)  native dtype (pre-tiled)

    # Scores for this tile on the MXU (bf16/f32 in, f32 accumulate); the
    # sequence lands on the lane axis.  Bias omitted: a per-row-constant
    # score shift cancels exactly under softmax.
    s = jnp.einsum('bkd,bsd->bks', w, x,
                   preferred_element_type=jnp.float32)               # (Bt,1,St)

    # Flash-style online softmax update across sequence tiles (all f32).
    m_prev = m_sc[...]
    m_new = jnp.maximum(m_prev, jnp.max(s, axis=2, keepdims=True))   # (Bt,1,1)
    alpha = jnp.exp(m_prev - m_new)                                  # (Bt,1,1)
    p = jnp.exp(s - m_new)                                           # (Bt,1,St)

    d_sc[...] = alpha * d_sc[...] + jnp.sum(p, axis=2, keepdims=True)
    # Un-normalized weighted sum of this tile, also on the MXU.  Only the
    # small (Bt,1,St) probability tile is cast to x.dtype; the big x tile is
    # consumed in its native dtype.
    acc_sc[...] = alpha * acc_sc[...] + jnp.einsum(
        'bks,bsd->bkd', p.astype(x.dtype), x,
        preferred_element_type=jnp.float32)                          # (Bt,1,D)
    m_sc[...] = m_new

    @pl.when(j == pl.num_programs(1) - 1)
    def _finalize():
        d = d_sc[...]
        inv = pl.reciprocal(d, approx=True)          # EUP vrcp (own VLIW slot)
        inv = inv * (2.0 - d * inv)                  # one Newton step -> ~f32 exact
        o_ref[...] = (acc_sc[...] * inv).astype(o_ref.dtype)


def _is_multi_tensorcore():
    """True on chips whose TensorCores are exposed via 'parallel' grid axes (v7x)."""
    try:
        kind = jax.devices()[0].device_kind.lower()
    except Exception:
        return False
    return ("v7" in kind) or ("7x" in kind)


def _choose_blocks(batch, seq, dim, itemsize, *, multi_core,
                   target_bytes=8 * 1024 * 1024):
    """Pick (block_b, block_s) so each x slab is ~target_bytes, dividing B/S.

    target_bytes defaults to 8 MiB: large enough that the ~0.35us fixed
    per-grid-step overhead is <10-15% of the DMA time on v5e/v6e/v7x, while a
    double-buffered slab still fits easily under the 48 MiB VMEM cap.
    """
    per_row = dim * itemsize
    per_batch = seq * per_row
    sub = 16 if itemsize < 4 else 8        # sublane multiple (bf16 packs in 16s)

    # Batch block: largest divisor of B whose slab stays under the target.
    # Only on multi-TensorCore chips (v7x) do we insist on >=2 batch grid
    # steps so the "parallel" axis can shard across both cores; on v5e/v6e
    # that restriction would just halve the DMA slab for nothing.
    cap_b = max(1, target_bytes // max(per_batch, 1))
    if multi_core and batch >= 2:
        cap_b = max(1, min(cap_b, batch // 2))
    block_b = 1
    for cand in range(1, min(batch, cap_b) + 1):
        if batch % cand == 0:
            block_b = cand

    # Sequence block: whole sequence if it fits, otherwise the largest
    # divisor of S under the target that is a multiple of 128 (lane-dense
    # scores / MXU columns), falling back to the sublane multiple.  The
    # online softmax handles the cross-tile reduction.
    if block_b * per_batch <= target_bytes:
        block_s = seq
    else:
        cap_s = max(1, target_bytes // max(block_b * per_row, 1))
        block_s = 0
        for step in (128, sub):
            best = 0
            for cand in range(step, min(seq, cap_s) + 1, step):
                if seq % cand == 0:
                    best = cand
            if best:
                block_s = best
                break
        if block_s == 0:                   # no aligned divisor: fall back to full S
            block_s = seq
    return block_b, block_s


def attention_pooling(x, w, b=None, *, block_b=None, block_s=None,
                      target_bytes=None):
    """x: [B, S, D] (f32/bf16), w: [D, 1], b: [1]  ->  pooled [B, D] in x.dtype.

    The Linear bias is accepted for API parity with the PyTorch module but is
    mathematically irrelevant: softmax(scores + c) == softmax(scores).
    """
    del b  # Constant shift of all scores in a row cancels exactly in softmax.
    B, S, D = x.shape
    itemsize = jnp.dtype(x.dtype).itemsize
    tb = (8 << 20) if target_bytes is None else int(target_bytes)
    auto_b, auto_s = _choose_blocks(B, S, D, itemsize,
                                    multi_core=_is_multi_tensorcore(),
                                    target_bytes=tb)
    block_b = auto_b if block_b is None else block_b
    block_s = auto_s if block_s is None else block_s
    if B % block_b != 0 or S % block_s != 0:
        raise ValueError("block_b / block_s must divide batch / seq")
    if block_s != S and block_s % 8 != 0:
        raise ValueError("block_s must be a multiple of 8 (or the full seq)")

    # Resident weight tile: pre-tiled to the batch block and pre-cast to
    # x.dtype so the kernel body has no broadcast_in_dim and no weight cast.
    # Its BlockSpec index is constant -> fetched once, stays in VMEM.
    w3 = jnp.broadcast_to(
        jnp.reshape(w, (1, 1, D)).astype(x.dtype), (block_b, 1, D))

    grid = (B // block_b, S // block_s)

    block_bytes = block_b * block_s * D * itemsize
    # Double-buffered x + resident w/output + small f32 scratch + compiler
    # internals.  Cap at 48 MiB so even v7x's 64 MiB physical VMEM keeps
    # headroom (v5e/v6e have 128 MiB, so 48 MiB is safe everywhere).
    vmem_limit = int(min(max(3 * block_bytes + (8 << 20), 32 << 20), 48 << 20))

    out3 = pl.pallas_call(
        _attention_pooling_kernel,
        out_shape=jax.ShapeDtypeStruct((B, 1, D), x.dtype),
        grid_spec=pltpu.PrefetchScalarGridSpec(
            num_scalar_prefetch=0,
            grid=grid,
            in_specs=[
                pl.BlockSpec((block_b, block_s, D), lambda i, j: (i, j, 0)),
                pl.BlockSpec((block_b, 1, D), lambda i, j: (0, 0, 0)),
            ],
            out_specs=pl.BlockSpec((block_b, 1, D), lambda i, j: (i, 0, 0)),
            scratch_shapes=[
                pltpu.VMEM((block_b, 1, 1), jnp.float32),   # running max
                pltpu.VMEM((block_b, 1, 1), jnp.float32),   # running denom
                pltpu.VMEM((block_b, 1, D), jnp.float32),   # running acc
            ],
        ),
        compiler_params=pltpu.CompilerParams(
            dimension_semantics=("parallel", "arbitrary"),
            vmem_limit_bytes=vmem_limit,
        ),
    )(x, w3)
    return out3.reshape(B, D)


def attention_pooling_ref(x, w, b):
    xf = x.astype(jnp.float32)
    scores = jnp.einsum("bsd,do->bso", xf, w.astype(jnp.float32))[..., 0]
    scores = scores + b.astype(jnp.float32)[0]
    weights = jax.nn.softmax(scores, axis=1)[..., None]
    return jnp.sum(xf * weights, axis=1)


if __name__ == "__main__":
    key = jax.random.PRNGKey(0)

    # --- Test 1: nominal small shapes (B=2, S=8, D=32), float32 -------------
    B, S, D = 2, 8, 32
    k1, k2, k3, key = jax.random.split(key, 4)
    x = jax.random.normal(k1, (B, S, D), dtype=jnp.float32)
    bound = 1.0 / (D ** 0.5)     # mimic nn.Linear(model_dim, 1) init range
    w = jax.random.uniform(k2, (D, 1), minval=-bound, maxval=bound,
                           dtype=jnp.float32)
    b = jax.random.uniform(k3, (1,), minval=-bound, maxval=bound,
                           dtype=jnp.float32)

    out = jax.block_until_ready(attention_pooling(x, w, b))
    ref = attention_pooling_ref(x, w, b)
    assert out.shape == (B, D)
    assert jnp.allclose(out, ref, atol=1e-4, rtol=1e-4), "f32 mismatch vs ref"

    # --- Test 2: bf16, multiple batch blocks + multiple 128-aligned seq tiles
    # (exercises the online-softmax accumulation path across S tiles)
    B2, S2, D2 = 32, 256, 128
    k4, k5, k6 = jax.random.split(key, 3)
    x2 = jax.random.normal(k4, (B2, S2, D2), dtype=jnp.float32).astype(jnp.bfloat16)
    bound2 = 1.0 / (D2 ** 0.5)
    w2 = jax.random.uniform(k5, (D2, 1), minval=-bound2, maxval=bound2,
                            dtype=jnp.float32)
    b2 = jax.random.uniform(k6, (1,), minval=-bound2, maxval=bound2,
                            dtype=jnp.float32)
    ref2 = attention_pooling_ref(x2, w2, b2)

    out2 = jax.block_until_ready(
        attention_pooling(x2, w2, b2, block_b=16, block_s=128))
    assert out2.shape == (B2, D2)
    assert jnp.allclose(out2.astype(jnp.float32), ref2, atol=2e-2, rtol=2e-2), \
        "bf16 mismatch vs ref (explicit blocks)"

    # --- Test 3: same bf16 problem through the auto block heuristic ---------
    out3 = jax.block_until_ready(attention_pooling(x2, w2, b2))
    assert jnp.allclose(out3.astype(jnp.float32), ref2, atol=2e-2, rtol=2e-2), \
        "bf16 mismatch vs ref (auto blocks)"

    print("KERNEL_OK")
</pallas_src>

<mosaic_0001>
module attributes {stable_mosaic.version = 11 : i64} {
  func.func @_attention_pooling_kernel(%arg0: i32, %arg1: i32, %arg2: memref<2x8x32xf32, #tpu.memory_space<vmem>>, %arg3: memref<2x1x32xf32, #tpu.memory_space<vmem>>, %arg4: memref<2x1x32xf32, #tpu.memory_space<vmem>>, %arg5: memref<2x1x1xf32, #tpu.memory_space<vmem>>, %arg6: memref<2x1x1xf32, #tpu.memory_space<vmem>>, %arg7: memref<2x1x32xf32, #tpu.memory_space<vmem>>) attributes {dimension_semantics = [#tpu.dimension_semantics<parallel>, #tpu.dimension_semantics<arbitrary>], iteration_bounds = array<i64: 1, 1>, scalar_prefetch = 0 : i64, scratch_operands = 3 : i64, tpu.core_type = #tpu.core_type<tc>, window_params = [{transform_indices = @transform_0, window_bounds = array<i64: 2, 8, 32>}, {pipeline_mode = #tpu.pipeline_mode<synchronous>, transform_indices = @transform_1, window_bounds = array<i64: 2, 1, 32>}, {transform_indices = @transform_2, window_bounds = array<i64: 2, 1, 32>}]} {
    %c0_i32 = arith.constant 0 : i32
    %0 = arith.cmpi eq, %arg1, %c0_i32 : i32
    %1 = arith.extui %0 : i1 to i32
    %c0_i32_0 = arith.constant 0 : i32
    %2 = arith.cmpi ne, %1, %c0_i32_0 : i32
    scf.if %2 {
      %cst_29 = arith.constant 0xFF800000 : f32
      %31 = vector.broadcast %cst_29 : f32 to vector<2x1x1xf32>
      %c0_30 = arith.constant 0 : index
      %c0_31 = arith.constant 0 : index
      %c0_32 = arith.constant 0 : index
      %32 = vector.load %arg5[%c0_30, %c0_31, %c0_32] : memref<2x1x1xf32, #tpu.memory_space<vmem>>, vector<2x1x1xf32>
      tpu.vector_store %arg5[%c0_30, %c0_31, %c0_32], %31 {strides = array<i32>} : memref<2x1x1xf32, #tpu.memory_space<vmem>>, vector<2x1x1xf32>,
      %cst_33 = arith.constant 0.000000e+00 : f32
      %33 = vector.broadcast %cst_33 : f32 to vector<2x1x1xf32>
      %c0_34 = arith.constant 0 : index
      %c0_35 = arith.constant 0 : index
      %c0_36 = arith.constant 0 : index
      %34 = vector.load %arg6[%c0_34, %c0_35, %c0_36] : memref<2x1x1xf32, #tpu.memory_space<vmem>>, vector<2x1x1xf32>
      tpu.vector_store %arg6[%c0_34, %c0_35, %c0_36], %33 {strides = array<i32>} : memref<2x1x1xf32, #tpu.memory_space<vmem>>, vector<2x1x1xf32>,
      %cst_37 = arith.constant 0.000000e+00 : f32
      %35 = vector.broadcast %cst_37 : f32 to vector<2x1x32xf32>
      %c0_38 = arith.constant 0 : index
      %c0_39 = arith.constant 0 : index
      %c0_40 = arith.constant 0 : index
      %36 = vector.load %arg7[%c0_38, %c0_39, %c0_40] : memref<2x1x32xf32, #tpu.memory_space<vmem>>, vector<2x1x32xf32>
      tpu.vector_store %arg7[%c0_38, %c0_39, %c0_40], %35 {strides = array<i32>} : memref<2x1x32xf32, #tpu.memory_space<vmem>>, vector<2x1x32xf32>,
    } else {
    }
    %c0 = arith.constant 0 : index
    %c0_1 = arith.constant 0 : index
    %c0_2 = arith.constant 0 : index
    %3 = vector.load %arg2[%c0, %c0_1, %c0_2] : memref<2x8x32xf32, #tpu.memory_space<vmem>>, vector<2x8x32xf32>
    %c0_3 = arith.constant 0 : index
    %c0_4 = arith.constant 0 : index
    %c0_5 = arith.constant 0 : index
    %4 = vector.load %arg3[%c0_3, %c0_4, %c0_5] : memref<2x1x32xf32, #tpu.memory_space<vmem>>, vector<2x1x32xf32>
    "tpu.trace_start"() <{level = 10 : i32, message = "bkd,bsd->bks"}> : () -> ()
    %cst = arith.constant dense<0.000000e+00> : vector<2x1x8xf32>
    %5 = tpu.matmul %4, %3, %cst {dimension_numbers = #tpu.dot_dimension_numbers<[2], [2], [1], [1], [0, 0, 0, 1, 1, 1], [0], [0]>} : vector<2x1x32xf32>, vector<2x8x32xf32>, vector<2x1x8xf32> -> vector<2x1x8xf32>
    "tpu.trace_stop"() : () -> ()
    %c0_6 = arith.constant 0 : index
    %c0_7 = arith.constant 0 : index
    %c0_8 = arith.constant 0 : index
    %6 = vector.load %arg5[%c0_6, %c0_7, %c0_8] : memref<2x1x1xf32, #tpu.memory_space<vmem>>, vector<2x1x1xf32>
    %cst_9 = arith.constant dense<0xFF800000> : vector<2x1xf32>
    %7 = vector.multi_reduction <maximumf>, %5, %cst_9 [2] : vector<2x1x8xf32> to vector<2x1xf32>
    %8 = vector.shape_cast %7 : vector<2x1xf32> to vector<2x1x1xf32>
    %9 = arith.maximumf %6, %8 : vector<2x1x1xf32>
    %10 = arith.subf %6, %9 : vector<2x1x1xf32>
    %11 = math.exp %10 : vector<2x1x1xf32>
    %12 = vector.broadcast %9 : vector<2x1x1xf32> to vector<2x1x8xf32>
    %13 = arith.subf %5, %12 : vector<2x1x8xf32>
    %14 = math.exp %13 : vector<2x1x8xf32>
    %c0_10 = arith.constant 0 : index
    %c0_11 = arith.constant 0 : index
    %c0_12 = arith.constant 0 : index
    %15 = vector.load %arg6[%c0_10, %c0_11, %c0_12] : memref<2x1x1xf32, #tpu.memory_space<vmem>>, vector<2x1x1xf32>
    %16 = arith.mulf %11, %15 : vector<2x1x1xf32>
    %cst_13 = arith.constant dense<0.000000e+00> : vector<2x1xf32>
    %17 = vector.multi_reduction <add>, %14, %cst_13 [2] : vector<2x1x8xf32> to vector<2x1xf32>
    %18 = vector.shape_cast %17 : vector<2x1xf32> to vector<2x1x1xf32>
    %19 = arith.addf %16, %18 : vector<2x1x1xf32>
    %c0_14 = arith.constant 0 : index
    %c0_15 = arith.constant 0 : index
    %c0_16 = arith.constant 0 : index
    %20 = vector.load %arg6[%c0_14, %c0_15, %c0_16] : memref<2x1x1xf32, #tpu.memory_space<vmem>>, vector<2x1x1xf32>
    tpu.vector_store %arg6[%c0_14, %c0_15, %c0_16], %19 {strides = array<i32>} : memref<2x1x1xf32, #tpu.memory_space<vmem>>, vector<2x1x1xf32>,
    %c0_17 = arith.constant 0 : index
    %c0_18 = arith.constant 0 : index
    %c0_19 = arith.constant 0 : index
    %21 = vector.load %arg7[%c0_17, %c0_18, %c0_19] : memref<2x1x32xf32, #tpu.memory_space<vmem>>, vector<2x1x32xf32>
    %22 = vector.broadcast %11 : vector<2x1x1xf32> to vector<2x1x32xf32>
    %23 = arith.mulf %22, %21 : vector<2x1x32xf32>
    "tpu.trace_start"() <{level = 10 : i32, message = "bks,bsd->bkd"}> : () -> ()
    %cst_20 = arith.constant dense<0.000000e+00> : vector<2x1x32xf32>
    %24 = tpu.matmul %14, %3, %cst_20 {dimension_numbers = #tpu.dot_dimension_numbers<[2], [1], [1], [2], [0, 0, 0, 1, 1, 2], [0], [0]>} : vector<2x1x8xf32>, vector<2x8x32xf32>, vector<2x1x32xf32> -> vector<2x1x32xf32>
    "tpu.trace_stop"() : () -> ()
    %25 = arith.addf %23, %24 : vector<2x1x32xf32>
    %c0_21 = arith.constant 0 : index
    %c0_22 = arith.constant 0 : index
    %c0_23 = arith.constant 0 : index
    %26 = vector.load %arg7[%c0_21, %c0_22, %c0_23] : memref<2x1x32xf32, #tpu.memory_space<vmem>>, vector<2x1x32xf32>
    tpu.vector_store %arg7[%c0_21, %c0_22, %c0_23], %25 {strides = array<i32>} : memref<2x1x32xf32, #tpu.memory_space<vmem>>, vector<2x1x32xf32>,
    %c0_24 = arith.constant 0 : index
    %c0_25 = arith.constant 0 : index
    %c0_26 = arith.constant 0 : index
    %27 = vector.load %arg5[%c0_24, %c0_25, %c0_26] : memref<2x1x1xf32, #tpu.memory_space<vmem>>, vector<2x1x1xf32>
    tpu.vector_store %arg5[%c0_24, %c0_25, %c0_26], %9 {strides = array<i32>} : memref<2x1x1xf32, #tpu.memory_space<vmem>>, vector<2x1x1xf32>,
    %c0_i32_27 = arith.constant 0 : i32
    %28 = arith.cmpi eq, %arg1, %c0_i32_27 : i32
    %29 = arith.extui %28 : i1 to i32
    %c0_i32_28 = arith.constant 0 : i32
    %30 = arith.cmpi ne, %29, %c0_i32_28 : i32
    scf.if %30 {
      %c0_29 = arith.constant 0 : index
      %c0_30 = arith.constant 0 : index
      %c0_31 = arith.constant 0 : index
      %31 = vector.load %arg6[%c0_29, %c0_30, %c0_31] : memref<2x1x1xf32, #tpu.memory_space<vmem>>, vector<2x1x1xf32>
      %32 = tpu.reciprocal %31 {approx = true} : vector<2x1x1xf32> -> vector<2x1x1xf32>
      %33 = arith.mulf %31, %32 : vector<2x1x1xf32>
      %cst_32 = arith.constant 2.000000e+00 : f32
      %34 = vector.broadcast %cst_32 : f32 to vector<2x1x1xf32>
      %35 = arith.subf %34, %33 : vector<2x1x1xf32>
      %36 = arith.mulf %32, %35 : vector<2x1x1xf32>
      %c0_33 = arith.constant 0 : index
      %c0_34 = arith.constant 0 : index
      %c0_35 = arith.constant 0 : index
      %37 = vector.load %arg7[%c0_33, %c0_34, %c0_35] : memref<2x1x32xf32, #tpu.memory_space<vmem>>, vector<2x1x32xf32>
      %38 = vector.broadcast %36 : vector<2x1x1xf32> to vector<2x1x32xf32>
      %39 = arith.mulf %37, %38 : vector<2x1x32xf32>
      %c0_36 = arith.constant 0 : index
      %c0_37 = arith.constant 0 : index
      %c0_38 = arith.constant 0 : index
      %40 = vector.load %arg4[%c0_36, %c0_37, %c0_38] : memref<2x1x32xf32, #tpu.memory_space<vmem>>, vector<2x1x32xf32>
      tpu.vector_store %arg4[%c0_36, %c0_37, %c0_38], %39 {strides = array<i32>} : memref<2x1x32xf32, #tpu.memory_space<vmem>>, vector<2x1x32xf32>,
    } else {
    }
    return
  }
  func.func @transform_0(%arg0: i32, %arg1: i32) -> (i32, i32, i32) {
    %c0_i32 = arith.constant 0 : i32
    %c0_i32_0 = arith.constant 0 : i32
    return %arg0, %arg1, %c0_i32 : i32, i32, i32
  }
  func.func @transform_1(%arg0: i32, %arg1: i32) -> (i32, i32, i32) {
    %c0_i32 = arith.constant 0 : i32
    %c0_i32_0 = arith.constant 0 : i32
    %c0_i32_1 = arith.constant 0 : i32
    %c0_i32_2 = arith.constant 0 : i32
    return %c0_i32, %c0_i32_0, %c0_i32_1 : i32, i32, i32
  }
  func.func @transform_2(%arg0: i32, %arg1: i32) -> (i32, i32, i32) {
    %c0_i32 = arith.constant 0 : i32
    %c0_i32_0 = arith.constant 0 : i32
    %c0_i32_1 = arith.constant 0 : i32
    return %arg0, %c0_i32, %c0_i32_0 : i32, i32, i32
  }
}

</mosaic_0001>

<bundles_post_ra>
// kernel: tpu_custom_call.1
= control target key start
LH: loop header
LB: loop body
LE: loop exit
PB: predicated region body
PF: predicated region fallthrough
CT: control target
= control target key end

     0   :  { %7 = vsyncpa [#allocation6], 0  ;;  %s451_s0 = inlined_call_operand.hbm [shape: f32[2,8,32], index: 0, kind: input, shape index: {}]   ;;  %s452_s1 = inlined_call_operand.hbm [shape: f32[2,1,32], index: 1, kind: input, shape index: {}]   ;;  %s453_s2 = inlined_call_operand.hbm [shape: f32[2,1,32], index: 2, kind: output, shape index: {}]  }
   0x1   :  { %8 = vsyncpa [#allocation9], 0 }
   0x2   :  { %9 = vsyncpa [#allocation7], 0  ;;  %s14_s11 = sshll.u32 %s451_s0, 4  ;;  %s393_s12 = smov [#allocation5]   ;;  %s15_s11 = int_to_ptr.hbm [resolvable:$true] %s14_s11 }
   0x3   :  { %s16_s13 = sshll.u32 %s393_s12, 4  ;;  %s27_s16 = sshll.u32 %s452_s1, 4  ;;  %s17_s13 = int_to_ptr.vmem [resolvable:$true] %s16_s13  ;;  %s28_s16 = int_to_ptr.hbm [resolvable:$true] %s27_s16 }
   0x4   :  { %s394_s17 = smov 128   ;;  %s395_s18 = smov 8  }
   0x5   :  { %22 = dma.hbm_to_vmem [thread:$0]  %s15_s11, 256, %s17_s13, [#allocation6], %s394_s17, %s394_s17, %s395_s18  }
   0x6   :  { %s396_s19 = smov [#allocation8]   ;;  %s397_s21 = smov 16  }
   0x7   :  { %s29_s20 = sshll.u32 %s396_s19, 4  ;;  %s398_s22 = smov 1   ;;  %s30_s20 = int_to_ptr.vmem [resolvable:$true] %s29_s20 }
   0x8   :  { %35 = dma.hbm_to_vmem [thread:$0]  %s28_s16, 32, %s30_s20, [#allocation9], %s397_s21, %s397_s21, %s398_s22  }
   0x9   :  { %387 = dma.done.wait [#allocation6], 256  }
   0xa   :  { %388 = vsyncadd [#allocation6], 4294967040 }
   0xb   :  { %389 = dma.done.wait [#allocation9], 32  }
   0xc   :  { %390 = vsyncadd [#allocation9], 4294967264  ;;  %vm60_vm0 = vcmask 261120   ;;  %v56_v0 = vld [vmem:[#allocation5] sm:$0xff]  ;;  %v57_v1 = vld [vmem:[#allocation5 + $0x8] sm:$0xff]  ;;  %vm48_vm1 = vcmask 0  }
   0xd   :  { %284 = vmatpush.xpose.msk.msra.mxu0 %vm60_vm0, %v56_v0  ;;  %v58_v2 = vld [vmem:[#allocation8] sm:$0x1]  ;;  %286 = vmatpush.xpose.msk.msra.mxu1 %vm60_vm0, %v57_v1  ;;  %v59_v3 = vld [vmem:[#allocation8 + $0x1] sm:$0x1]  ;;  %v399_v4 = vmov -inf   ;;  %vm115_vm2 = vcmask 57344  }
   0xe   :  { %198 = vmatpush.msra.mxu2 %v56_v0  ;;  %221 = vmatpush.msra.mxu3 %v57_v1  ;;  %49 = vst.msk [vmem:[#allocation2] sm:$0x1] %vm48_vm1, %v399_v4  ;;  %v400_v9 = vmov 0   ;;  %v401_v10 = vmov 0.0   ;;  %vm53_vm3 = vcmask 253952   ;;  %vm179_vm4 = vcmask 64512  }
   0xf   :  { %50 = vst.msk [vmem:[#allocation2 + $0x1] sm:$0x1] %vm48_vm1, %v399_v4  ;;  %300 = vset.pattern.permute.xlu1 %v400_v9  ;;  %301 = vset.pattern.permute.xlu0 %v400_v9  ;;  %s402_s0 = smov [#allocation10]   ;;  %s270_s25 = sshll.u32 %s453_s2, 4  ;;  %s271_s25 = int_to_ptr.hbm [resolvable:$true] %s270_s25 }
  0x10   :  { %285 = vmatmul.msk.f32.vlgmr.msra.gmra.mxu0 %vm60_vm0, %v58_v2  ;;  %287 = vmatmul.msk.f32.vlgmr.msra.gmra.mxu1 %vm60_vm0, %v59_v3  ;;  %51 = vst.msk [vmem:[#allocation3] sm:$0x1] %vm48_vm1, %v401_v10  ;;  %s268_s1 = sshll.u32 %s402_s0, 4  ;;  %s269_s1 = int_to_ptr.vmem [resolvable:$true] %s268_s1 }
  0x11   :  { %302 = vset.pattern.permute.xlu2 %v400_v9  ;;  %52 = vst.msk [vmem:[#allocation3 + $0x1] sm:$0x1] %vm48_vm1, %v401_v10 }
  0x12   :  { %54 = vst.msk [vmem:[#allocation4] sm:$0x1] %vm53_vm3, %v401_v10 }
  0x13   :  { %55 = vst.msk [vmem:[#allocation4 + $0x1] sm:$0x1] %vm53_vm3, %v401_v10 }
  0x15   :  { %v113_v11 = vld [vmem:[#allocation2] sm:$0x1] }
  0x16   :  { %v114_v16 = vld [vmem:[#allocation2 + $0x1] sm:$0x1] }
  0x17   :  { %v148_v35 = vld [vmem:[#allocation3] sm:$0x1] }
  0x18   :  { %v149_v39 = vld [vmem:[#allocation3 + $0x1] sm:$0x1] }
  0x19   :  { %v163_v46 = vld [vmem:[#allocation4] sm:$0x1] }
  0x1a   :  { %v164_v55 = vld [vmem:[#allocation4 + $0x1] sm:$0x1] }
  0x8d   :  { %v84_v5 = vpop.f32.mrf.mxu0  ;;  %v110_v7 = vpop.f32.mrf.mxu1 }
  0x8e   :  { %v116_v6 = vsel %vm115_vm2, %v84_v5, -inf  ;;  %v119_v8 = vsel %vm115_vm2, %v110_v7, -inf }
  0x8f   :  { %117 = vmax.xlane.f32.xlu0 %v116_v6 }
  0x97   :  { %120 = vmax.xlane.f32.xlu0 %v119_v8 }
 0x102   :  { %v118_v12 = vpop.xlane.xlu0 %117 }
 0x103   :  { %v122_v13 = vmax.f32 %v113_v11, %v118_v12 }
 0x105   :  { %v124_v14 = vsub.f32 %v113_v11, %v122_v13  ;;  %231 = vst.msk [vmem:[#allocation2] sm:$0x1] %vm48_vm1, %v122_v13  ;;  %132 = vperm.xlu1 %300, %v122_v13  }
 0x107   :  { %v126_v15 = vmul.f32 1.442695, %v124_v14 }
 0x109   :  { %303 = vpow2.f32 %v126_v15 }
 0x10a   :  { %v121_v17 = vpop.xlane.xlu0 %120 }
 0x10b   :  { %v123_v18 = vmax.f32 %v114_v16, %v121_v17 }
 0x10d   :  { %v125_v19 = vsub.f32 %v114_v16, %v123_v18  ;;  %232 = vst.msk [vmem:[#allocation2 + $0x1] sm:$0x1] %vm48_vm1, %v123_v18  ;;  %138 = vperm.xlu1 %300, %v123_v18  }
 0x10f   :  { %v304_v20 = vpop.eup %303  ;;  %v128_v21 = vmul.f32 1.442695, %v125_v19 }
 0x110   :  { %167 = vperm.xlu0 %301, %v304_v20   ;;  %v150_v36 = vmul.f32 %v304_v20, %v148_v35 }
 0x111   :  { %305 = vpow2.f32 %v128_v21 }
 0x117   :  { %v306_v22 = vpop.eup %305 }
 0x118   :  { %173 = vperm.xlu1 %300, %v306_v22   ;;  %v151_v41 = vmul.f32 %v306_v22, %v149_v39 }
 0x177   :  { %v133_v23 = vpop.permute.xlu1 %132 }
 0x178   :  { %v135_v24 = vperm.slane %v133_v23, 0 }
 0x17a   :  { %v142_v25 = vsub.f32 %v84_v5, %v135_v24 }
 0x17c   :  { %v144_v26 = vmul.f32 1.442695, %v142_v25 }
 0x17e   :  { %307 = vpow2.f32 %v144_v26 }
 0x17f   :  { %v139_v27 = vpop.permute.xlu1 %138 }
 0x180   :  { %v141_v28 = vperm.slane %v139_v27, 0 }
 0x182   :  { %v143_v29 = vsub.f32 %v110_v7, %v141_v28  ;;  %v168_v40 = vpop.permute.xlu0 %167 }
 0x183   :  { %v170_v44 = vperm.slane %v168_v40, 0 }
 0x184   :  { %v308_v30 = vpop.eup %307  ;;  %v146_v31 = vmul.f32 1.442695, %v143_v29 }
 0x185   :  { %288 = vmatmul.msk.f32.vlgmr.msra.gmra.mxu2 %vm179_vm4, %v308_v30  ;;  %v152_v32 = vsel %vm115_vm2, %v308_v30, 0.0  ;;  %v177_v47 = vmul.f32 %v170_v44, %v163_v46 }
 0x186   :  { %309 = vpow2.f32 %v146_v31  ;;  %153 = vadd.xlane.f32.xlu2 %v152_v32 }
 0x18a   :  { %v174_v48 = vpop.permute.xlu1 %173 }
 0x18b   :  { %v176_v52 = vperm.slane %v174_v48, 0 }
 0x18c   :  { %v310_v33 = vpop.eup %309 }
 0x18d   :  { %289 = vmatmul.msk.f32.vlgmr.msra.gmra.mxu3 %vm179_vm4, %v310_v33  ;;  %v155_v34 = vsel %vm115_vm2, %v310_v33, 0.0  ;;  %v178_v57 = vmul.f32 %v176_v52, %v164_v55 }
 0x18e   :  { %156 = vadd.xlane.f32.xlu2 %v155_v34 }
 0x1f9   :  { %v154_v37 = vpop.xlane.xlu2 %153 }
 0x1fa   :  { %v158_v38 = vadd.f32 %v154_v37, %v150_v36 }
 0x1fc   :  { %161 = vst.msk [vmem:[#allocation3] sm:$0x1] %vm48_vm1, %v158_v38 }
 0x201   :  { %v157_v42 = vpop.xlane.xlu2 %156 }
 0x202   :  { %v159_v43 = vadd.f32 %v157_v42, %v151_v41 }
 0x203   :  { %v236_v45 = vld [vmem:[#allocation3] sm:$0x1] }
 0x204   :  { %162 = vst.msk [vmem:[#allocation3 + $0x1] sm:$0x1] %vm48_vm1, %v159_v43  ;;  %311 = vrcp.f32 %v236_v45 }
 0x208   :  { %v200_v49 = vpop.f32.mrf.mxu2 }
 0x209   :  { %v226_v50 = vadd.f32 %v200_v49, %v177_v47 }
 0x20a   :  { %v312_v51 = vpop.eup %311 }
 0x20b   :  { %229 = vst.msk [vmem:[#allocation4] sm:$0x1] %vm53_vm3, %v226_v50  ;;  %v240_v53 = vmul.f32 %v312_v51, %v236_v45  ;;  %v237_v54 = vld [vmem:[#allocation3 + $0x1] sm:$0x1] }
 0x20c   :  { %313 = vrcp.f32 %v237_v54 }
 0x20d   :  { %v242_v56 = vsub.f32 2.0, %v240_v53 }
 0x20f   :  { %v244_v58 = vmul.f32 %v312_v51, %v242_v56 }
 0x210   :  { %v223_v59 = vpop.f32.mrf.mxu3 }
 0x211   :  { %v227_v60 = vadd.f32 %v223_v59, %v178_v57  ;;  %250 = vperm.xlu2 %302, %v244_v58  }
 0x212   :  { %v314_v61 = vpop.eup %313  ;;  %v246_v3 = vld [vmem:[#allocation4] sm:$0x1] }
 0x213   :  { %230 = vst.msk [vmem:[#allocation4 + $0x1] sm:$0x1] %vm53_vm3, %v227_v60  ;;  %v241_v62 = vmul.f32 %v314_v61, %v237_v54 }
 0x215   :  { %v243_v63 = vsub.f32 2.0, %v241_v62 }
 0x217   :  { %v245_v0 = vmul.f32 %v314_v61, %v243_v63 }
 0x219   :  { %256 = vperm.xlu1 %300, %v245_v0  }
 0x21a   :  { %v247_v7 = vld [vmem:[#allocation4 + $0x1] sm:$0x1] }
 0x26b   :  { %v251_v1 = vpop.permute.xlu2 %250 }
 0x26c   :  { %v253_v2 = vperm.slane %v251_v1, 0 }
 0x26e   :  { %v260_v4 = vmul.f32 %v253_v2, %v246_v3 }
 0x270   :  { %262 = vst.msk [vmem:[#allocation10] sm:$0x1] %vm53_vm3, %v260_v4 }
 0x28b   :  { %v257_v5 = vpop.permute.xlu1 %256 }
 0x28c   :  { %v259_v6 = vperm.slane %v257_v5, 0 }
 0x28e   :  { %v261_v8 = vmul.f32 %v259_v6, %v247_v7 }
 0x290   :  { %263 = vst.msk [vmem:[#allocation10 + $0x1] sm:$0x1] %vm53_vm3, %v261_v8 }
 0x291   :  { %276 = dma.vmem_to_hbm [thread:$0]  %s269_s1, 32, %s271_s25, [#allocation7], %s397_s21, %s397_s21, %s398_s22  }
 0x292   :  { %391 = dma.done.wait [#allocation7], 32  }
 0x293   :  { %392 = vsyncadd [#allocation7], 4294967264 }
 0x294   :  { %281 = vsyncpa [#allocation6], 1 }
 0x295   :  { %282 = vsyncpa [#allocation9], 1 }
 0x296   :  { %283 = vsyncpa [#allocation7], 1 }

</bundles_post_ra>
